<compile_context>
chip_gen: v5e
topology: v5e:2x2
jax: 0.10.0
libtpu: 0.0.40
codegen_flags: <defaults>
</compile_context>

<pallas_src>
import jax
import jax.numpy as jnp
from jax.experimental import pallas as pl
from jax.experimental.pallas import tpu as pltpu

HIDDEN1 = 128
HIDDEN2 = 64
MIN_TILE = 16       # bf16 sublane packing granule for the batch dim
TB_MAX = 2048       # max batch-tile rows (VMEM footprint stays ~ a few MiB)


def _round_up(n, m):
    return (n + m - 1) // m * m


# ----------------------------------------------------------------------------
# Kernel: one batch tile per grid step; weights resident (constant index_map).
# ----------------------------------------------------------------------------
def dqn_mlp_kernel(x_ref, w1_ref, b1_ref, w2_ref, b2_ref, w3_ref, b3_ref, o_ref):
    # x_ref : (TB, d_in)       bf16
    # w1_ref: (d_in, 128)      bf16   b1_ref: (1, 128)   f32
    # w2_ref: (128, 128)       bf16   b2_ref: (1, 128)   f32  (cols 64..127 zero)
    # w3_ref: (128, d_out)     bf16   b3_ref: (1, d_out) f32  (rows 64..127 zero)
    # o_ref : (TB, d_out)      f32
    x = x_ref[...]

    h1 = jnp.dot(x, w1_ref[...], preferred_element_type=jnp.float32) + b1_ref[...]
    h1 = jnp.maximum(h1, 0.0).astype(jnp.bfloat16)

    h2 = jnp.dot(h1, w2_ref[...], preferred_element_type=jnp.float32) + b2_ref[...]
    h2 = jnp.maximum(h2, 0.0).astype(jnp.bfloat16)

    out = jnp.dot(h2, w3_ref[...], preferred_element_type=jnp.float32) + b3_ref[...]
    o_ref[...] = out.astype(o_ref.dtype)


# ----------------------------------------------------------------------------
# Parameter preparation: lane-dense *internal* dims only; weights cast to bf16.
# Zero padding of hidden2 (64 -> 128) is mathematically exact.
# ----------------------------------------------------------------------------
def prepare_params(params):
    w1, b1, w2, b2, w3, b3 = (params["w1"], params["b1"], params["w2"],
                              params["b2"], params["w3"], params["b3"])
    d_in = w1.shape[0]
    d_out = w3.shape[1]

    w1p = w1.astype(jnp.bfloat16)                                   # (d_in, 128)
    b1p = b1.reshape(1, HIDDEN1).astype(jnp.float32)

    w2p = jnp.zeros((HIDDEN1, HIDDEN1), jnp.bfloat16)
    w2p = w2p.at[:, :HIDDEN2].set(w2.astype(jnp.bfloat16))          # (128, 128)
    b2p = jnp.zeros((1, HIDDEN1), jnp.float32).at[:, :HIDDEN2].set(
        b2.reshape(1, HIDDEN2).astype(jnp.float32))

    w3p = jnp.zeros((HIDDEN1, d_out), jnp.bfloat16)
    w3p = w3p.at[:HIDDEN2, :].set(w3.astype(jnp.bfloat16))          # (128, d_out)
    b3p = b3.reshape(1, d_out).astype(jnp.float32)

    return dict(w1=w1p, b1=b1p, w2=w2p, b2=b2p, w3=w3p, b3=b3p,
                d_in=d_in, d_out=d_out)


# ----------------------------------------------------------------------------
# Tiling choice: big tiles, minimal batch padding, >=2 (even) tiles for large
# batches so v7x's 2 TensorCores share the grid (cheap no-op on v5e/v6e).
# ----------------------------------------------------------------------------
def _choose_tiling(B, tb_max=TB_MAX, min_tile=MIN_TILE):
    n = pl.cdiv(B, tb_max)
    if B >= 512:                      # big enough to be worth splitting over 2 TCs
        n = max(n, 2)
    if n > 1 and n % 2 == 1:          # even tile count balances the 2 TCs
        n += 1
    tb = _round_up(pl.cdiv(B, n), min_tile)
    n = pl.cdiv(B, tb)
    return tb, tb * n, n


def _vmem_budget_bytes(tb, d_in, d_out):
    # resident bf16 weights + f32 biases
    w_bytes = (d_in * HIDDEN1 + HIDDEN1 * HIDDEN1 + HIDDEN1 * d_out) * 2 \
              + (2 * HIDDEN1 + d_out) * 4
    # double-buffered input (bf16) and output (f32) tiles
    io_bytes = 2 * (tb * d_in * 2 + tb * d_out * 4)
    # in-kernel activations h1/h2 (f32 accum + bf16 copy, be generous)
    act_bytes = 2 * tb * HIDDEN1 * 6
    return max(4 << 20, 2 * (w_bytes + io_bytes + act_bytes))


# ----------------------------------------------------------------------------
# Wrapper: minimal batch pad, gridded pallas_call, slice padded rows away.
# ----------------------------------------------------------------------------
def dqn_forward(x, prepared):
    w1, b1, w2, b2, w3, b3 = (prepared["w1"], prepared["b1"], prepared["w2"],
                              prepared["b2"], prepared["w3"], prepared["b3"])
    d_in, d_out = prepared["d_in"], prepared["d_out"]

    B = x.shape[0]
    TB, Bp, n_tiles = _choose_tiling(B)

    x_bf = x.astype(jnp.bfloat16)
    if Bp != B:
        # TODO(synk): could mask the ragged tile in-kernel via scalar prefetch
        # instead of padding; at (Bp - B) < 16 rows the pad cost is negligible.
        x_bf = jnp.pad(x_bf, ((0, Bp - B), (0, 0)))

    out = pl.pallas_call(
        dqn_mlp_kernel,
        out_shape=jax.ShapeDtypeStruct((Bp, d_out), jnp.float32),
        grid=(n_tiles,),
        in_specs=[
            pl.BlockSpec((TB, d_in), lambda i: (i, 0)),        # x tile (pipelined)
            pl.BlockSpec((d_in, HIDDEN1), lambda i: (0, 0)),   # weights: resident
            pl.BlockSpec((1, HIDDEN1), lambda i: (0, 0)),
            pl.BlockSpec((HIDDEN1, HIDDEN1), lambda i: (0, 0)),
            pl.BlockSpec((1, HIDDEN1), lambda i: (0, 0)),
            pl.BlockSpec((HIDDEN1, d_out), lambda i: (0, 0)),
            pl.BlockSpec((1, d_out), lambda i: (0, 0)),
        ],
        out_specs=pl.BlockSpec((TB, d_out), lambda i: (i, 0)),
        compiler_params=pltpu.CompilerParams(
            dimension_semantics=("parallel",),                 # v7x: 2 TCs share batch
            vmem_limit_bytes=_vmem_budget_bytes(TB, d_in, d_out),
        ),
    )(x_bf, w1, b1, w2, b2, w3, b3)

    return out[:B] if Bp != B else out


# ----------------------------------------------------------------------------
# Init + references
# ----------------------------------------------------------------------------
def init_params(key, input_dim, output_dim):
    """Deterministic synthetic init (shapes match the nn.Linear layers,
    weights stored transposed to (in, out) so the kernel does y = x @ W + b)."""
    k1, k2, k3 = jax.random.split(key, 3)
    w1 = jax.random.normal(k1, (input_dim, HIDDEN1), jnp.float32) * (1.0 / jnp.sqrt(input_dim))
    b1 = jnp.zeros((1, HIDDEN1), jnp.float32)
    w2 = jax.random.normal(k2, (HIDDEN1, HIDDEN2), jnp.float32) * (1.0 / jnp.sqrt(float(HIDDEN1)))
    b2 = jnp.zeros((1, HIDDEN2), jnp.float32)
    w3 = jax.random.normal(k3, (HIDDEN2, output_dim), jnp.float32) * (1.0 / jnp.sqrt(float(HIDDEN2)))
    b3 = jnp.zeros((1, output_dim), jnp.float32)
    return dict(w1=w1, b1=b1, w2=w2, b2=b2, w3=w3, b3=b3)


def dqn_forward_ref_f32(x, p):
    h1 = jnp.maximum(x @ p["w1"] + p["b1"], 0.0)
    h2 = jnp.maximum(h1 @ p["w2"] + p["b2"], 0.0)
    return h2 @ p["w3"] + p["b3"]


def dqn_forward_ref_bf16(x, p):
    """Reference at the kernel's operand precision (bf16 matmul operands, f32 accumulate)."""
    bf = jnp.bfloat16
    h1 = jnp.dot(x.astype(bf), p["w1"].astype(bf), preferred_element_type=jnp.float32) + p["b1"]
    h1 = jnp.maximum(h1, 0.0)
    h2 = jnp.dot(h1.astype(bf), p["w2"].astype(bf), preferred_element_type=jnp.float32) + p["b2"]
    h2 = jnp.maximum(h2, 0.0)
    return jnp.dot(h2.astype(bf), p["w3"].astype(bf), preferred_element_type=jnp.float32) + p["b3"]


if __name__ == "__main__":
    key = jax.random.PRNGKey(0)
    kx, kp = jax.random.split(key)

    batch, input_dim, output_dim = 2, 16, 4
    x = jax.random.normal(kx, (batch, input_dim), jnp.float32)
    params = init_params(kp, input_dim, output_dim)
    prepared = prepare_params(params)

    out = dqn_forward(x, prepared)
    jax.block_until_ready(out)

    assert out.shape == (batch, output_dim)

    # Tight check vs. a reference at the kernel's own precision (bf16 operands).
    ref_bf16 = dqn_forward_ref_bf16(x, params)
    assert jnp.allclose(out, ref_bf16, atol=1e-3, rtol=1e-3), "mismatch vs bf16 reference"

    # Sanity check vs. the full-f32 PyTorch-equivalent math (bf16 rounding slack).
    ref_f32 = dqn_forward_ref_f32(x, params)
    assert jnp.allclose(out, ref_f32, atol=1e-1, rtol=1e-1), "mismatch vs f32 reference"

    # Also exercise a multi-tile / ragged batch to cover the gridded + padded path.
    big_B = 600
    xb = jax.random.normal(kx, (big_B, input_dim), jnp.float32)
    out_big = dqn_forward(xb, prepared)
    jax.block_until_ready(out_big)
    assert out_big.shape == (big_B, output_dim)
    assert jnp.allclose(out_big, dqn_forward_ref_bf16(xb, params), atol=1e-3, rtol=1e-3), \
        "mismatch vs bf16 reference (big batch)"

    print("KERNEL_OK")
</pallas_src>

<mosaic_0001>
module attributes {stable_mosaic.version = 11 : i64} {
  func.func @dqn_mlp_kernel(%arg0: i32, %arg1: memref<16x16xbf16, #tpu.memory_space<vmem>>, %arg2: memref<16x128xbf16, #tpu.memory_space<vmem>>, %arg3: memref<1x128xf32, #tpu.memory_space<vmem>>, %arg4: memref<128x128xbf16, #tpu.memory_space<vmem>>, %arg5: memref<1x128xf32, #tpu.memory_space<vmem>>, %arg6: memref<128x4xbf16, #tpu.memory_space<vmem>>, %arg7: memref<1x4xf32, #tpu.memory_space<vmem>>, %arg8: memref<16x4xf32, #tpu.memory_space<vmem>>) attributes {dimension_semantics = [#tpu.dimension_semantics<parallel>], iteration_bounds = array<i64: 1>, scalar_prefetch = 0 : i64, scratch_operands = 0 : i64, tpu.core_type = #tpu.core_type<tc>, window_params = [{transform_indices = @transform_0, window_bounds = array<i64: 16, 16>}, {pipeline_mode = #tpu.pipeline_mode<synchronous>, transform_indices = @transform_1, window_bounds = array<i64: 16, 128>}, {pipeline_mode = #tpu.pipeline_mode<synchronous>, transform_indices = @transform_2, window_bounds = array<i64: 1, 128>}, {pipeline_mode = #tpu.pipeline_mode<synchronous>, transform_indices = @transform_3, window_bounds = array<i64: 128, 128>}, {pipeline_mode = #tpu.pipeline_mode<synchronous>, transform_indices = @transform_4, window_bounds = array<i64: 1, 128>}, {pipeline_mode = #tpu.pipeline_mode<synchronous>, transform_indices = @transform_5, window_bounds = array<i64: 128, 4>}, {pipeline_mode = #tpu.pipeline_mode<synchronous>, transform_indices = @transform_6, window_bounds = array<i64: 1, 4>}, {transform_indices = @transform_7, window_bounds = array<i64: 16, 4>}]} {
    %c0 = arith.constant 0 : index
    %c0_0 = arith.constant 0 : index
    %0 = vector.load %arg1[%c0, %c0_0] : memref<16x16xbf16, #tpu.memory_space<vmem>>, vector<16x16xbf16>
    %c0_1 = arith.constant 0 : index
    %c0_2 = arith.constant 0 : index
    %1 = vector.load %arg2[%c0_1, %c0_2] : memref<16x128xbf16, #tpu.memory_space<vmem>>, vector<16x128xbf16>
    %cst = arith.constant dense<0.000000e+00> : vector<16x128xf32>
    %2 = tpu.matmul %0, %1, %cst {dimension_numbers = #tpu.dot_dimension_numbers<[1], [0], [0], [1], [0, 0, 1, 1], [], []>} : vector<16x16xbf16>, vector<16x128xbf16>, vector<16x128xf32> -> vector<16x128xf32>
    %c0_3 = arith.constant 0 : index
    %c0_4 = arith.constant 0 : index
    %3 = vector.load %arg3[%c0_3, %c0_4] : memref<1x128xf32, #tpu.memory_space<vmem>>, vector<1x128xf32>
    %4 = vector.broadcast %3 : vector<1x128xf32> to vector<16x128xf32>
    %5 = arith.addf %2, %4 : vector<16x128xf32>
    %cst_5 = arith.constant 0.000000e+00 : f32
    %6 = vector.broadcast %cst_5 : f32 to vector<16x128xf32>
    %7 = arith.maximumf %5, %6 : vector<16x128xf32>
    %8 = arith.truncf %7 : vector<16x128xf32> to vector<16x128xbf16>
    %c0_6 = arith.constant 0 : index
    %c0_7 = arith.constant 0 : index
    %9 = vector.load %arg4[%c0_6, %c0_7] : memref<128x128xbf16, #tpu.memory_space<vmem>>, vector<128x128xbf16>
    %cst_8 = arith.constant dense<0.000000e+00> : vector<16x128xf32>
    %10 = tpu.matmul %8, %9, %cst_8 {dimension_numbers = #tpu.dot_dimension_numbers<[1], [0], [0], [1], [0, 0, 1, 1], [], []>} : vector<16x128xbf16>, vector<128x128xbf16>, vector<16x128xf32> -> vector<16x128xf32>
    %c0_9 = arith.constant 0 : index
    %c0_10 = arith.constant 0 : index
    %11 = vector.load %arg5[%c0_9, %c0_10] : memref<1x128xf32, #tpu.memory_space<vmem>>, vector<1x128xf32>
    %12 = vector.broadcast %11 : vector<1x128xf32> to vector<16x128xf32>
    %13 = arith.addf %10, %12 : vector<16x128xf32>
    %cst_11 = arith.constant 0.000000e+00 : f32
    %14 = vector.broadcast %cst_11 : f32 to vector<16x128xf32>
    %15 = arith.maximumf %13, %14 : vector<16x128xf32>
    %16 = arith.truncf %15 : vector<16x128xf32> to vector<16x128xbf16>
    %c0_12 = arith.constant 0 : index
    %c0_13 = arith.constant 0 : index
    %17 = vector.load %arg6[%c0_12, %c0_13] : memref<128x4xbf16, #tpu.memory_space<vmem>>, vector<128x4xbf16>
    %cst_14 = arith.constant dense<0.000000e+00> : vector<16x4xf32>
    %18 = tpu.matmul %16, %17, %cst_14 {dimension_numbers = #tpu.dot_dimension_numbers<[1], [0], [0], [1], [0, 0, 1, 1], [], []>} : vector<16x128xbf16>, vector<128x4xbf16>, vector<16x4xf32> -> vector<16x4xf32>
    %c0_15 = arith.constant 0 : index
    %c0_16 = arith.constant 0 : index
    %19 = vector.load %arg7[%c0_15, %c0_16] : memref<1x4xf32, #tpu.memory_space<vmem>>, vector<1x4xf32>
    %20 = vector.broadcast %19 : vector<1x4xf32> to vector<16x4xf32>
    %21 = arith.addf %18, %20 : vector<16x4xf32>
    %c0_17 = arith.constant 0 : index
    %c0_18 = arith.constant 0 : index
    %22 = vector.load %arg8[%c0_17, %c0_18] : memref<16x4xf32, #tpu.memory_space<vmem>>, vector<16x4xf32>
    tpu.vector_store %arg8[%c0_17, %c0_18], %21 {strides = array<i32>} : memref<16x4xf32, #tpu.memory_space<vmem>>, vector<16x4xf32>,
    return
  }
  func.func @transform_0(%arg0: i32) -> (i32, i32) {
    %c0_i32 = arith.constant 0 : i32
    %c0_i32_0 = arith.constant 0 : i32
    return %arg0, %c0_i32 : i32, i32
  }
  func.func @transform_1(%arg0: i32) -> (i32, i32) {
    %c0_i32 = arith.constant 0 : i32
    %c0_i32_0 = arith.constant 0 : i32
    %c0_i32_1 = arith.constant 0 : i32
    return %c0_i32, %c0_i32_0 : i32, i32
  }
  func.func @transform_2(%arg0: i32) -> (i32, i32) {
    %c0_i32 = arith.constant 0 : i32
    %c0_i32_0 = arith.constant 0 : i32
    %c0_i32_1 = arith.constant 0 : i32
    return %c0_i32, %c0_i32_0 : i32, i32
  }
  func.func @transform_3(%arg0: i32) -> (i32, i32) {
    %c0_i32 = arith.constant 0 : i32
    %c0_i32_0 = arith.constant 0 : i32
    %c0_i32_1 = arith.constant 0 : i32
    return %c0_i32, %c0_i32_0 : i32, i32
  }
  func.func @transform_4(%arg0: i32) -> (i32, i32) {
    %c0_i32 = arith.constant 0 : i32
    %c0_i32_0 = arith.constant 0 : i32
    %c0_i32_1 = arith.constant 0 : i32
    return %c0_i32, %c0_i32_0 : i32, i32
  }
  func.func @transform_5(%arg0: i32) -> (i32, i32) {
    %c0_i32 = arith.constant 0 : i32
    %c0_i32_0 = arith.constant 0 : i32
    %c0_i32_1 = arith.constant 0 : i32
    return %c0_i32, %c0_i32_0 : i32, i32
  }
  func.func @transform_6(%arg0: i32) -> (i32, i32) {
    %c0_i32 = arith.constant 0 : i32
    %c0_i32_0 = arith.constant 0 : i32
    %c0_i32_1 = arith.constant 0 : i32
    return %c0_i32, %c0_i32_0 : i32, i32
  }
  func.func @transform_7(%arg0: i32) -> (i32, i32) {
    %c0_i32 = arith.constant 0 : i32
    %c0_i32_0 = arith.constant 0 : i32
    return %arg0, %c0_i32 : i32, i32
  }
}

</mosaic_0001>

<bundles_post_ra>
// kernel: tpu_custom_call.1
= control target key start
LH: loop header
LB: loop body
LE: loop exit
PB: predicated region body
PF: predicated region fallthrough
CT: control target
= control target key end

     0   :  { %12 = vsyncpa [#allocation3], 0  ;;  %s538_s0 = inlined_call_operand.hbm [shape: bf16[16,16], index: 0, kind: input, shape index: {}]   ;;  %s539_s1 = inlined_call_operand.hbm [shape: bf16[16,128], index: 1, kind: input, shape index: {}]   ;;  %s540_s2 = inlined_call_operand.vmem [shape: f32[1,128], index: 2, kind: input, shape index: {}]   ;;  %s541_s3 = inlined_call_operand.vmem [shape: bf16[128,128], index: 3, kind: input, shape index: {}]   ;;  %s542_s4 = inlined_call_operand.vmem [shape: f32[1,128], index: 4, kind: input, shape index: {}]   ;;  %s543_s5 = inlined_call_operand.vmem [shape: bf16[128,4], index: 5, kind: input, shape index: {}]   ;;  %s544_s6 = inlined_call_operand.vmem [shape: f32[1,4], index: 6, kind: input, shape index: {}]   ;;  %s545_s7 = inlined_call_operand.vmem [shape: f32[16,4], index: 7, kind: output, shape index: {}]  }
   0x1   :  { %s18_s26 = sshll.u32 %s538_s0, 4  ;;  %s19_s26 = int_to_ptr.hbm [resolvable:$true] %s18_s26 }
   0x2   :  { %13 = vsyncpa [#allocation5], 0  ;;  %s425_s27 = smov [#allocation2]   ;;  %s31_s8 = sshll.u32 %s539_s1, 4  ;;  %s32_s8 = int_to_ptr.hbm [resolvable:$true] %s31_s8 }
   0x3   :  { %s20_s28 = sshll.u32 %s425_s27, 4  ;;  %s426_s9 = smov 64   ;;  %s21_s28 = int_to_ptr.vmem [resolvable:$true] %s20_s28 }
   0x4   :  { %s427_s10 = smov 4   ;;  %s428_s11 = smov [#allocation4]  }
   0x5   :  { %26 = dma.hbm_to_vmem [thread:$0]  %s19_s26, 128, %s21_s28, [#allocation3], %s426_s9, %s426_s9, %s427_s10  }
   0x6   :  { %s33_s12 = sshll.u32 %s428_s11, 4  ;;  %s34_s12 = int_to_ptr.vmem [resolvable:$true] %s33_s12 }
   0x7   :  { %39 = dma.hbm_to_vmem [thread:$0]  %s32_s8, 128, %s34_s12, [#allocation5], %s426_s9, %s426_s9, %s427_s10  }
   0x8   :  { %421 = dma.done.wait [#allocation3], 128  }
   0x9   :  { %422 = vsyncadd [#allocation3], 4294967168 }
   0xa   :  { %423 = dma.done.wait [#allocation5], 128  }
   0xb   :  { %424 = vsyncadd [#allocation5], 4294967168  ;;  %v349_v0 = vld [vmem:[#allocation4] sm:$0xff]  ;;  %v357_v1 = vld [vmem:[%s541_s3 + $0x38] sm:$0xff]  ;;  %vm78_vm0 = vcmask 130048   ;;  %vm266_vm1 = vcmask 31744  }
   0xc   :  { %v348_v2 = vld [vmem:[#allocation2] sm:$0xff]  ;;  %89 = vmatpush.bf16.msra.mxu0 %v349_v0  ;;  %167 = vmatpush.bf16.msra.mxu1 %v357_v1  ;;  %v356_v3 = vld [vmem:[%s541_s3 + $0x30] sm:$0xff]  ;;  %v355_v4 = vld [vmem:[%s541_s3 + $0x28] sm:$0xff] }
   0xd   :  { %v354_v5 = vld [vmem:[%s541_s3 + $0x20] sm:$0xff]  ;;  %v353_v6 = vld [vmem:[%s541_s3 + $0x18] sm:$0xff]  ;;  %v352_v7 = vld [vmem:[%s541_s3 + $0x10] sm:$0xff] }
   0xe   :  { %v351_v8 = vld [vmem:[%s541_s3 + $0x8] sm:$0xff]  ;;  %v350_v9 = vld [vmem:[%s541_s3] sm:$0xff]  ;;  %v365_v10 = vld [vmem:[%s543_s5 + $0x38] sm:$0xff] }
   0xf   :  { %283 = vmatmul.msk.bf16.vlgmr.msra.gmra.mxu0 %vm78_vm0, %v348_v2  ;;  %252 = vmatpush.bf16.msra.mxu2 %v365_v10  ;;  %v364_v11 = vld [vmem:[%s543_s5 + $0x30] sm:$0xff]  ;;  %v363_v12 = vld [vmem:[%s543_s5 + $0x28] sm:$0xff]  ;;  %v362_v13 = vld [vmem:[%s543_s5 + $0x20] sm:$0xff] }
  0x10   :  { %168 = vmatpush.bf16.msra.mxu1 %v356_v3  ;;  %v370_v15 = vld [vmem:[%s540_s2] ss:$0 sm:$0xff]  ;;  %v361_v22 = vld [vmem:[%s543_s5 + $0x18] sm:$0xff]  ;;  %v360_v23 = vld [vmem:[%s543_s5 + $0x10] sm:$0xff] }
  0x11   :  { %v359_v24 = vld [vmem:[%s543_s5 + $0x8] sm:$0xff]  ;;  %v358_v25 = vld [vmem:[%s543_s5] sm:$0xff] }
  0x12   :  { %v371_v27 = vld [vmem:[%s542_s4] ss:$0 sm:$0xff] }
  0x13   :  { %253 = vmatpush.bf16.msra.mxu2 %v364_v11  ;;  %v372_v34 = vld [vmem:[%s544_s6] ss:$0 sm:$0xff] }
  0x14   :  { %169 = vmatpush.bf16.msra.mxu1 %v355_v4 }
  0x17   :  { %254 = vmatpush.bf16.msra.mxu2 %v363_v12 }
  0x18   :  { %170 = vmatpush.bf16.msra.mxu1 %v354_v5 }
  0x1b   :  { %255 = vmatpush.bf16.msra.mxu2 %v362_v13 }
  0x1c   :  { %171 = vmatpush.bf16.msra.mxu1 %v353_v6 }
  0x1f   :  { %256 = vmatpush.bf16.msra.mxu2 %v361_v22 }
  0x20   :  { %172 = vmatpush.bf16.msra.mxu1 %v352_v7 }
  0x23   :  { %257 = vmatpush.bf16.msra.mxu2 %v360_v23 }
  0x24   :  { %173 = vmatpush.bf16.msra.mxu1 %v351_v8 }
  0x27   :  { %258 = vmatpush.bf16.msra.mxu2 %v359_v24 }
  0x28   :  { %174 = vmatpush.bf16.msra.mxu1 %v350_v9 }
  0x2b   :  { %259 = vmatpush.bf16.msra.mxu2 %v358_v25 }
  0x8c   :  { %v91_v14 = vpop.f32.mrf.mxu0 }
  0x8d   :  { %v92_v16 = vadd.f32 %v370_v15, %v91_v14 }
  0x8f   :  { %v96_v19 = vmax.f32 %v92_v16, 0.0 }
  0x94   :  { %v93_v17 = vpop.f32.mrf.mxu0 }
  0x95   :  { %v94_v18 = vadd.f32 %v370_v15, %v93_v17 }
  0x97   :  { %v97_v20 = vmax.f32 %v94_v18, 0.0 }
  0x99   :  { %v98_v21 = vpack.c.bf16 %v97_v20, %v96_v19 }
  0x9b   :  { %175 = vmatmul.bf16.vlgmr.msra.gmra.mxu1 %v98_v21 }
 0x118   :  { %v176_v26 = vpop.f32.mrf.mxu1 }
 0x119   :  { %v177_v28 = vadd.f32 %v371_v27, %v176_v26 }
 0x11b   :  { %v181_v31 = vmax.f32 %v177_v28, 0.0 }
 0x120   :  { %v178_v29 = vpop.f32.mrf.mxu1 }
 0x121   :  { %v179_v30 = vadd.f32 %v371_v27, %v178_v29 }
 0x123   :  { %v182_v32 = vmax.f32 %v179_v30, 0.0 }
 0x125   :  { %v183_v33 = vpack.c.bf16 %v182_v32, %v181_v31 }
 0x127   :  { %260 = vmatmul.bf16.vlgmr.msra.gmra.mxu2 %v183_v33 }
 0x1aa   :  { %v261_v35 = vpop.f32.mrf.mxu2 }
 0x1ab   :  { %v262_v36 = vadd.f32 %v372_v34, %v261_v35 }
 0x1ad   :  { %267 = vst.msk [vmem:[%s545_s7] sm:$0xff] %vm266_vm1, %v262_v36 }
 0x1b2   :  { %v263_v37 = vpop.f32.mrf.mxu2 }
 0x1b3   :  { %v264_v38 = vadd.f32 %v372_v34, %v263_v37 }
 0x1b5   :  { %268 = vst.msk [vmem:[%s545_s7 + $0x8] sm:$0xff] %vm266_vm1, %v264_v38 }
 0x1b6   :  { %273 = vsyncpa [#allocation3], 1 }
 0x1b7   :  { %274 = vsyncpa [#allocation5], 1 }

</bundles_post_ra>
